<compile_context>
chip_gen: v7x
topology: tpu7x:2x2x1
jax: 0.10.0
libtpu: 0.0.40
codegen_flags: <defaults>
</compile_context>

<pallas_src>
import functools

import numpy as np

import jax
import jax.numpy as jnp
from jax.experimental import pallas as pl
from jax.experimental.pallas import tpu as pltpu


# ----------------------------------------------------------------------------
# helpers
# ----------------------------------------------------------------------------
def _hardswish(x):
    # nn.Hardswish: x * relu6(x + 3) / 6   (used by the pure-JAX reference)
    return x * jnp.clip(x + 3.0, 0.0, 6.0) * (1.0 / 6.0)


def _roll_probe_kernel(x_ref, o_ref):
    o_ref[...] = pltpu.roll(x_ref[...], 1, 1)


_ROLL_SIGN = []


def _roll_sign():
    """+1 if pltpu.roll follows jnp.roll semantics (out[i] = x[i - shift]), -1 if opposite.

    The probe runs one real pallas_call on the default (TPU) backend, outside tracing,
    and asserts one of the two orientations so a mis-detection cannot pass silently.
    """
    if not _ROLL_SIGN:
        x = jnp.arange(8 * 128, dtype=jnp.float32).reshape(8, 128)
        y = pl.pallas_call(
            _roll_probe_kernel,
            out_shape=jax.ShapeDtypeStruct((8, 128), jnp.float32),
        )(x)
        y00 = float(y[0, 0])
        if y00 == float(x[0, 127]):
            _ROLL_SIGN.append(1)
        elif y00 == float(x[0, 1]):
            _ROLL_SIGN.append(-1)
        else:
            raise AssertionError("unexpected pltpu.roll semantics")
    return _ROLL_SIGN[0]


def _geometry_code(H, W, HW, n_imgs, L):
    """(1, L) int32 per-lane code: 4 boundary-validity bits + image id (bits 4+)."""
    lane = np.arange(L)
    c = lane % W
    r = (lane // W) % H
    img = (lane // HW).astype(np.int32)
    code = ((c > 0).astype(np.int32)
            | ((c < W - 1).astype(np.int32) << 1)
            | ((r > 0).astype(np.int32) << 2)
            | ((r < H - 1).astype(np.int32) << 3)
            | (img << 4))
    return jnp.asarray(np.asarray(code, dtype=np.int32).reshape(1, L))


# ----------------------------------------------------------------------------
# Fused DecoderBlock kernel: conv1 (InvertedResidual) + conv2 (InvertedResidual).
# Activations are (C, L) blocks: C on sublanes, L = images_per_block * H * W on lanes.
# ----------------------------------------------------------------------------
def _block_kernel(*refs, k_parts, W, HW, n_imgs,
                  mid1, red1, has_skip1, mid2, red2, cout, roll_sign):
    it = iter(refs)
    code_ref = next(it)
    xs = [next(it) for _ in range(k_parts)]
    w1x_ref = next(it)
    w1s_ref = next(it) if has_skip1 else None
    w1p_ref = next(it)
    slab1_ref = next(it)
    w2x_ref = next(it)
    w2p_ref = next(it)
    slab2_ref = next(it)
    row_ref = next(it)
    o_ref = next(it)

    L = o_ref.shape[1]

    # --- in-kernel boundary / image masks (decoded from the packed geometry code) ---
    code = code_ref[...]                       # (1, L) int32
    mcl = (code & 1) > 0                       # column c > 0      (left neighbour valid)
    mcr = (code & 2) > 0                       # column c < W - 1  (right neighbour valid)
    mrt = (code & 4) > 0                       # row r > 0         (upper neighbour valid)
    mrb = (code & 8) > 0                       # row r < H - 1     (lower neighbour valid)
    img_id = (code >> 4) if n_imgs > 1 else None

    rowv = row_ref[...]                        # (1, 2 + red1 + red2)
    sse_b1 = rowv[0:1, 0:1]
    sse_b2 = rowv[0:1, 1:2]
    cse_b1_1 = rowv[0:1, 2:2 + red1]
    cse_b1_2 = rowv[0:1, 2 + red1:2 + red1 + red2]

    inv6hw = 1.0 / (6.0 * float(HW))

    def depthwise(h6, dw):
        # 3x3 depthwise, stride 1, pad 1: 2 horizontal rolls, 3 per-row partial sums,
        # 2 vertical rolls.  Column/row masks kill cross-row / cross-image wraparound.
        hm = jnp.where(mcl, pltpu.roll(h6, (roll_sign * 1) % L, 1), 0.0)      # (r, c-1)
        hp = jnp.where(mcr, pltpu.roll(h6, (roll_sign * (-1)) % L, 1), 0.0)   # (r, c+1)
        t0 = hm * dw[:, 0:1] + h6 * dw[:, 1:2] + hp * dw[:, 2:3]   # kernel row di = -1
        t1 = hm * dw[:, 3:4] + h6 * dw[:, 4:5] + hp * dw[:, 5:6]   # kernel row di =  0
        t2 = hm * dw[:, 6:7] + h6 * dw[:, 7:8] + hp * dw[:, 8:9]   # kernel row di = +1
        acc = t1
        acc = acc + jnp.where(mrt, pltpu.roll(t0, (roll_sign * W) % L, 1), 0.0)
        acc = acc + jnp.where(mrb, pltpu.roll(t2, (roll_sign * (-W)) % L, 1), 0.0)
        return acc

    def scse(g6, cse_w1, cse_b1, cse_w2, cse_b2, sse_w6, sse_b):
        # g6 = 6 * h ; sse_w6 / cse path carry the 1/6 factor (folded at pack time).
        s = jax.nn.sigmoid(jnp.sum(g6 * sse_w6, axis=0, keepdims=True) + sse_b)   # (1, L)
        if n_imgs == 1:
            mean = jnp.sum(g6, axis=1, keepdims=True) * inv6hw                    # (mid, 1)
            z = jnp.maximum(jnp.sum(cse_w1 * mean, axis=0, keepdims=True) + cse_b1, 0.0)
            e = jax.nn.sigmoid(jnp.sum(cse_w2 * z, axis=1, keepdims=True) + cse_b2)
            return g6 * (s + e)
        gate = s
        for n in range(n_imgs):
            m = img_id == n
            mean = jnp.sum(jnp.where(m, g6, 0.0), axis=1, keepdims=True) * inv6hw
            z = jnp.maximum(jnp.sum(cse_w1 * mean, axis=0, keepdims=True) + cse_b1, 0.0)
            e = jax.nn.sigmoid(jnp.sum(cse_w2 * z, axis=1, keepdims=True) + cse_b2)
            gate = gate + jnp.where(m, e, 0.0)
        return g6 * gate

    def inv_residual(x_cat, w_x, w_s, w_p, slab, cse_b1, sse_b, mid, red):
        # slab columns: [bn1_b, bn2_b, bn3_b, skip_b, cse_b2, sse_w/6, dw*bn2/6 (9),
        #                cse_w1 (red), cse_w2 (red)]
        b1 = slab[0:mid, 0:1]
        b2 = slab[0:mid, 1:2]
        b3 = slab[0:cout, 2:3]
        bsk = slab[0:cout, 3:4]
        cse_b2 = slab[0:mid, 4:5]
        sse_w6 = slab[0:mid, 5:6]
        dw = slab[0:mid, 6:15]
        cse_w1 = slab[0:mid, 15:15 + red]
        cse_w2 = slab[0:mid, 15 + red:15 + 2 * red]

        # expand: 1x1 conv (BN scale folded into the weights) + Hardswish (x6, 1/6 in dw)
        z1 = jnp.dot(w_x, x_cat, preferred_element_type=jnp.float32) + b1
        h6 = z1 * jnp.clip(z1 + 3.0, 0.0, 6.0)

        # residual / skip path (1x1 conv + BN, fully folded)
        if w_s is not None:
            sk = jnp.dot(w_s, x_cat, preferred_element_type=jnp.float32) + bsk
        else:
            sk = x_cat                                       # identity (cin == cout)

        # depthwise 3x3 (+BN) + Hardswish (x6, 1/6 folded downstream)
        z2 = depthwise(h6, dw) + b2
        g6 = z2 * jnp.clip(z2 + 3.0, 0.0, 6.0)

        # scSE gating, then project (1x1 conv, BN scale + 1/6 folded)
        g = scse(g6, cse_w1, cse_b1, cse_w2, cse_b2, sse_w6, sse_b)
        y = jnp.dot(w_p, g, preferred_element_type=jnp.float32) + b3
        return sk + y

    x_vals = [x[...] for x in xs]
    x_cat = x_vals[0] if k_parts == 1 else jnp.concatenate(x_vals, axis=0)

    y1 = inv_residual(x_cat, w1x_ref[...],
                      w1s_ref[...] if has_skip1 else None,
                      w1p_ref[...], slab1_ref[...], cse_b1_1, sse_b1, mid1, red1)
    y2 = inv_residual(y1, w2x_ref[...], None,
                      w2p_ref[...], slab2_ref[...], cse_b1_2, sse_b2, mid2, red2)
    o_ref[...] = y2.astype(o_ref.dtype)


def fused_decoder_block(packed, parts, N, H, W):
    """Fused DecoderBlock (conv1+conv2).  `parts` are the channel-concat inputs at the
    (H, W) output resolution, each (C_i, N*H*W); part 0 is the (already upsampled) x."""
    HW = H * W
    M = N * HW

    w1x, w1p, slab1 = packed['w1x'], packed['w1p'], packed['slab1']
    w2x, w2p, slab2 = packed['w2x'], packed['w2p'], packed['slab2']
    rowvec = packed['rowvec']
    has_skip1 = 'w1s' in packed

    mid1 = int(w1x.shape[0])
    mid2 = int(w2x.shape[0])
    cout = int(w2p.shape[0])
    cin_total = int(w1x.shape[1])
    red1 = (int(slab1.shape[1]) - 15) // 2
    red2 = (int(slab2.shape[1]) - 15) // 2
    assert sum(int(p.shape[0]) for p in parts) == cin_total
    assert int(w1p.shape[0]) == cout and int(w2x.shape[1]) == cout

    # images per grid block: keep blocks whole-image (scSE pooling) and lane-tile friendly
    # (L multiple of 128 or equal to the full array); prefer grid >= 2 when it is free.
    n_imgs = 1
    while n_imgs < N and n_imgs * HW < 128 and N % (2 * n_imgs) == 0:
        n_imgs *= 2
    if (n_imgs * HW) % 128 != 0 and n_imgs < N:
        n_imgs = N
    if N % n_imgs != 0:
        n_imgs = N
    L = n_imgs * HW
    grid = (N // n_imgs,)

    code = _geometry_code(H, W, HW, n_imgs, L)

    param_arrays = [w1x] + ([packed['w1s']] if has_skip1 else []) \
        + [w1p, slab1, w2x, w2p, slab2, rowvec]
    inputs = [code] + list(parts) + param_arrays

    in_specs = [pl.BlockSpec((1, L), lambda i: (0, 0))]
    in_specs += [pl.BlockSpec((int(p.shape[0]), L), lambda i: (0, i)) for p in parts]
    in_specs += [pl.BlockSpec((int(a.shape[0]), int(a.shape[1])), lambda i: (0, 0))
                 for a in param_arrays]
    out_specs = pl.BlockSpec((cout, L), lambda i: (0, i))

    kernel = functools.partial(
        _block_kernel, k_parts=len(parts), W=W, HW=HW, n_imgs=n_imgs,
        mid1=mid1, red1=red1, has_skip1=has_skip1, mid2=mid2, red2=red2,
        cout=cout, roll_sign=_roll_sign())

    flops = 2 * M * (mid1 * cin_total + (cout * cin_total if has_skip1 else 0)
                     + 9 * mid1 + cout * mid1
                     + mid2 * cout + 9 * mid2 + cout * mid2)
    transcendentals = 2 * M + N * (mid1 + mid2)
    bytes_accessed = 4 * (sum(int(p.size) for p in parts) + cout * M
                          + sum(int(a.size) for a in param_arrays) + int(code.size))

    # explicit scoped-VMEM limit sized from the block footprint (v5e default is 16 MiB)
    live = 4 * L * (2 * (cin_total + cout) + 8 * max(mid1, mid2, cout) + 2)
    params_b = 8 * sum(int(a.size) for a in param_arrays)
    vmem_limit = int(min(64 * 2 ** 20, max(32 * 2 ** 20, 2 * (live + params_b))))

    return pl.pallas_call(
        kernel,
        out_shape=jax.ShapeDtypeStruct((cout, M), parts[0].dtype),
        grid=grid,
        in_specs=in_specs,
        out_specs=out_specs,
        compiler_params=pltpu.CompilerParams(
            dimension_semantics=("parallel",),
            vmem_limit_bytes=vmem_limit),
        cost_estimate=pl.CostEstimate(flops=int(flops),
                                      transcendentals=int(transcendentals),
                                      bytes_accessed=int(bytes_accessed)),
    )(*inputs)


# ----------------------------------------------------------------------------
# Parameter packing: fold BN scales / Hardswish 1/6 into conv weights, pack the
# small per-channel tensors into one slab per InvertedResidual.
# ----------------------------------------------------------------------------
def _pack_inverted_residual(p):
    mid = int(p['pw1_w'].shape[0])
    cout = int(p['pw2_w'].shape[0])
    red = int(p['cse_w1'].shape[1])
    R = max(mid, cout)

    w_x = p['pw1_w'] * p['bn1_scale']                      # bn1 scale folded
    w_p = p['pw2_w'] * p['bn3_scale'] * (1.0 / 6.0)        # bn3 scale + hswish2 1/6
    dw_f = p['dw_w'] * p['bn2_scale'] * (1.0 / 6.0)        # bn2 scale + hswish1 1/6
    sse_w6 = p['sse_w'] * (1.0 / 6.0)                      # hswish2 1/6 (sSE branch)
    cse_w1 = p['cse_w1']                                   # 1/(6*HW) applied in-kernel

    has_skip = 'skip_w' in p
    if has_skip:
        w_s = p['skip_w'] * p['skip_scale']
        skip_bias = p['skip_bias']                         # conv bias already folded in
    else:
        w_s = None
        skip_bias = jnp.zeros((cout, 1), jnp.float32)

    def col(v):
        r = int(v.shape[0])
        if r == R:
            return v
        return jnp.concatenate([v, jnp.zeros((R - r, v.shape[1]), jnp.float32)], axis=0)

    slab = jnp.concatenate(
        [col(p['bn1_bias']), col(p['bn2_bias']), col(p['bn3_bias']), col(skip_bias),
         col(p['cse_b2']), col(sse_w6), col(dw_f), col(cse_w1), col(p['cse_w2'])],
        axis=1)                                            # (R, 15 + 2*red)
    row = jnp.concatenate([p['sse_b'].reshape(1, 1), p['cse_b1'].reshape(1, red)], axis=1)
    return dict(w_x=w_x, w_s=w_s, w_p=w_p, slab=slab, row=row)


def pack_decoder_block(bp):
    c1 = _pack_inverted_residual(bp['conv1'])
    c2 = _pack_inverted_residual(bp['conv2'])
    assert c2['w_s'] is None, "conv2 of a DecoderBlock is always same-shape"
    rowvec = jnp.concatenate([c1['row'][:, 0:1], c2['row'][:, 0:1],
                              c1['row'][:, 1:], c2['row'][:, 1:]], axis=1)
    packed = dict(w1x=c1['w_x'], w1p=c1['w_p'], slab1=c1['slab'],
                  w2x=c2['w_x'], w2p=c2['w_p'], slab2=c2['slab'], rowvec=rowvec)
    if c1['w_s'] is not None:
        packed['w1s'] = c1['w_s']
    return packed


# ----------------------------------------------------------------------------
# Decoder wiring (module semantics)
# ----------------------------------------------------------------------------
def _upsample2x(x, N, H, W):
    """Nearest 2x upsample in the channel-major layout: (C, N*H*W) -> (C, N*2H*2W)."""
    # TODO(synk): XLA glue; folding into the fused kernel needs an in-kernel lane expansion.
    C = x.shape[0]
    x = x.reshape(C, N, H, W)
    x = jnp.repeat(jnp.repeat(x, 2, axis=2), 2, axis=3)
    return x.reshape(C, N * 4 * H * W)


def decoder_block(packed, x, N, H, W, skip_parts=None):
    """x: (C_in, N*H*W) at (H, W); returns (C_out, N*2H*2W) at (2H, 2W)."""
    x_up = _upsample2x(x, N, H, W)
    parts = [x_up] + (list(skip_parts) if skip_parts else [])
    return fused_decoder_block(packed, parts, N, 2 * H, 2 * W)


def decoder_forward(packed_blocks, depth, features):
    """features: NCHW encoder features, shallow -> deep (as the PyTorch decoder receives)."""
    N = int(features[0].shape[0])
    feats_nchw = list(features)[1:][::-1]
    shapes = [(int(f.shape[2]), int(f.shape[3])) for f in feats_nchw]
    # channel-major flattened layout (C, N*H*W) used between all decoder kernels
    feats = [jnp.transpose(f, (1, 0, 2, 3)).reshape(f.shape[1], -1) for f in feats_nchw]

    dense_x, dense_hw = {}, {}
    for layer_idx in range(depth):
        for depth_idx in range(depth - layer_idx):
            if layer_idx == 0:
                H, W = shapes[depth_idx]
                out = decoder_block(packed_blocks[f'x_{depth_idx}_{depth_idx}'],
                                    feats[depth_idx], N, H, W,
                                    skip_parts=[feats[depth_idx + 1]])
                dense_x[f'x_{depth_idx}_{depth_idx}'] = out
                dense_hw[f'x_{depth_idx}_{depth_idx}'] = (2 * H, 2 * W)
            else:
                dense_l_i = depth_idx + layer_idx
                skip_parts = [dense_x[f'x_{idx}_{dense_l_i}']
                              for idx in range(depth_idx + 1, dense_l_i + 1)]
                skip_parts.append(feats[dense_l_i + 1])
                H, W = dense_hw[f'x_{depth_idx}_{dense_l_i - 1}']
                dense_x[f'x_{depth_idx}_{dense_l_i}'] = decoder_block(
                    packed_blocks[f'x_{depth_idx}_{dense_l_i}'],
                    dense_x[f'x_{depth_idx}_{dense_l_i - 1}'], N, H, W, skip_parts)
                dense_hw[f'x_{depth_idx}_{dense_l_i}'] = (2 * H, 2 * W)
    H, W = dense_hw[f'x_0_{depth - 1}']
    out = decoder_block(packed_blocks[f'x_0_{depth}'],
                        dense_x[f'x_0_{depth - 1}'], N, H, W)
    Hf, Wf = 2 * H, 2 * W
    C = out.shape[0]
    return jnp.transpose(out.reshape(C, N, Hf, Wf), (1, 0, 2, 3))   # back to NCHW


# ----------------------------------------------------------------------------
# Parameter initialization (deterministic, synthetic, inference-mode BN)
# ----------------------------------------------------------------------------
def _init_bn(key, c, eps=1e-5):
    kg, kb = jax.random.split(key)
    gamma = jax.random.uniform(kg, (c,), jnp.float32, 0.5, 1.5)
    beta = jax.random.uniform(kb, (c,), jnp.float32, -0.1, 0.1)
    running_mean = jnp.zeros((c,), jnp.float32)
    running_var = jnp.ones((c,), jnp.float32)
    scale = gamma / jnp.sqrt(running_var + eps)
    bias = beta - running_mean * scale
    return scale.reshape(c, 1), bias.reshape(c, 1)


def init_inverted_residual(key, in_ch, out_ch, expansion_ratio=1, squeeze_ratio=1):
    mid = expansion_ratio * in_ch
    red = max(mid // squeeze_ratio, 1)
    ks = jax.random.split(key, 16)
    p = {}
    p['pw1_w'] = jax.random.normal(ks[0], (mid, in_ch), jnp.float32) / jnp.sqrt(float(in_ch))
    p['bn1_scale'], p['bn1_bias'] = _init_bn(ks[1], mid)
    p['dw_w'] = jax.random.normal(ks[2], (mid, 9), jnp.float32) * (1.0 / 3.0)
    p['bn2_scale'], p['bn2_bias'] = _init_bn(ks[3], mid)
    # scSE: cSE FC1 stored transposed (mid, red); FC2 in its natural (mid, red); sSE (mid, 1)
    p['cse_w1'] = jax.random.normal(ks[4], (mid, red), jnp.float32) / jnp.sqrt(float(mid))
    p['cse_b1'] = jax.random.normal(ks[5], (1, red), jnp.float32) * 0.01
    p['cse_w2'] = jax.random.normal(ks[6], (mid, red), jnp.float32) / jnp.sqrt(float(red))
    p['cse_b2'] = jax.random.normal(ks[7], (mid, 1), jnp.float32) * 0.01
    p['sse_w'] = jax.random.normal(ks[8], (mid, 1), jnp.float32) / jnp.sqrt(float(mid))
    p['sse_b'] = jax.random.normal(ks[9], (1, 1), jnp.float32) * 0.01
    p['pw2_w'] = jax.random.normal(ks[10], (out_ch, mid), jnp.float32) / jnp.sqrt(float(mid))
    p['bn3_scale'], p['bn3_bias'] = _init_bn(ks[11], out_ch)
    if in_ch != out_ch:
        p['skip_w'] = (jax.random.normal(ks[12], (out_ch, in_ch), jnp.float32)
                       / jnp.sqrt(float(in_ch)))
        conv_b = jax.random.normal(ks[13], (out_ch, 1), jnp.float32) * 0.01
        s, b = _init_bn(ks[14], out_ch)
        p['skip_scale'] = s
        p['skip_bias'] = b + conv_b * s     # fold the skip conv bias through the BN affine
    return p


def init_decoder_block(key, in_ch, skip_ch, out_ch, expansion_ratio=1, squeeze_ratio=1):
    k1, k2 = jax.random.split(key)
    return {
        'conv1': init_inverted_residual(k1, in_ch + skip_ch, out_ch,
                                        expansion_ratio, squeeze_ratio),
        'conv2': init_inverted_residual(k2, out_ch, out_ch,
                                        expansion_ratio, squeeze_ratio),
    }


def init_decoder(key, encoder_channels, decoder_channels,
                 expansion_ratio=1, squeeze_ratio=1):
    enc = list(encoder_channels[1:])[::-1]
    head_channels = enc[0]
    in_channels = [head_channels] + list(decoder_channels[:-1])
    skip_channels = list(enc[1:]) + [0]
    out_channels = list(decoder_channels)
    blocks = {}
    for layer_idx in range(len(in_channels) - 1):
        for depth_idx in range(layer_idx + 1):
            if depth_idx == 0:
                in_ch = in_channels[layer_idx]
                skip_ch = skip_channels[layer_idx] * (layer_idx + 1)
                out_ch = out_channels[layer_idx]
            else:
                out_ch = skip_channels[layer_idx]
                skip_ch = skip_channels[layer_idx] * (layer_idx + 1 - depth_idx)
                in_ch = skip_channels[layer_idx - 1]
            key, sub = jax.random.split(key)
            blocks[f'x_{depth_idx}_{layer_idx}'] = init_decoder_block(
                sub, in_ch, skip_ch, out_ch, expansion_ratio, squeeze_ratio)
    key, sub = jax.random.split(key)
    blocks[f'x_{0}_{len(in_channels) - 1}'] = init_decoder_block(
        sub, in_channels[-1], 0, out_channels[-1], expansion_ratio, squeeze_ratio)
    depth = len(in_channels) - 1
    return blocks, depth


# ----------------------------------------------------------------------------
# Pure-JAX reference (inference-mode BN), used as the correctness gate
# ----------------------------------------------------------------------------
_HI = jax.lax.Precision.HIGHEST


def _ref_inverted_residual(p, x):
    N, Cin, H, W = x.shape
    mid = p['pw1_w'].shape[0]
    cout = p['pw2_w'].shape[0]
    h = jnp.einsum('oc,nchw->nohw', p['pw1_w'], x, precision=_HI)
    h = _hardswish(h * p['bn1_scale'].reshape(1, mid, 1, 1)
                   + p['bn1_bias'].reshape(1, mid, 1, 1))
    hp = jnp.pad(h, ((0, 0), (0, 0), (1, 1), (1, 1)))
    dwk = p['dw_w'].reshape(mid, 3, 3)
    acc = jnp.zeros_like(h)
    for di in range(3):
        for dj in range(3):
            acc = acc + hp[:, :, di:di + H, dj:dj + W] * dwk[:, di, dj].reshape(1, mid, 1, 1)
    h = _hardswish(acc * p['bn2_scale'].reshape(1, mid, 1, 1)
                   + p['bn2_bias'].reshape(1, mid, 1, 1))
    mean = jnp.mean(h, axis=(2, 3))                                                  # (N, mid)
    z = jnp.maximum(jnp.einsum('nc,cr->nr', mean, p['cse_w1'], precision=_HI)
                    + p['cse_b1'], 0.0)
    e = jax.nn.sigmoid(jnp.einsum('nr,cr->nc', z, p['cse_w2'], precision=_HI)
                       + p['cse_b2'][:, 0][None, :])
    s = jax.nn.sigmoid(jnp.einsum('c,nchw->nhw', p['sse_w'][:, 0], h, precision=_HI)
                       + p['sse_b'][0, 0])
    h = h * e[:, :, None, None] + h * s[:, None, :, :]
    y = jnp.einsum('oc,nchw->nohw', p['pw2_w'], h, precision=_HI)
    y = y * p['bn3_scale'].reshape(1, cout, 1, 1) + p['bn3_bias'].reshape(1, cout, 1, 1)
    if 'skip_w' in p:
        sk = jnp.einsum('oc,nchw->nohw', p['skip_w'], x, precision=_HI)
        sk = (sk * p['skip_scale'].reshape(1, cout, 1, 1)
              + p['skip_bias'].reshape(1, cout, 1, 1))
    else:
        sk = x
    return sk + y


def _ref_decoder_block(p, x, skip=None):
    x = jnp.repeat(jnp.repeat(x, 2, axis=2), 2, axis=3)
    if skip is not None:
        x = jnp.concatenate([x, skip], axis=1)
    x = _ref_inverted_residual(p['conv1'], x)
    x = _ref_inverted_residual(p['conv2'], x)
    return x


def _ref_decoder_forward(blocks, depth, features):
    feats = list(features)[1:][::-1]
    dense_x = {}
    for layer_idx in range(depth):
        for depth_idx in range(depth - layer_idx):
            if layer_idx == 0:
                dense_x[f'x_{depth_idx}_{depth_idx}'] = _ref_decoder_block(
                    blocks[f'x_{depth_idx}_{depth_idx}'],
                    feats[depth_idx], feats[depth_idx + 1])
            else:
                dense_l_i = depth_idx + layer_idx
                cat = [dense_x[f'x_{idx}_{dense_l_i}']
                       for idx in range(depth_idx + 1, dense_l_i + 1)]
                cat = jnp.concatenate(cat + [feats[dense_l_i + 1]], axis=1)
                dense_x[f'x_{depth_idx}_{dense_l_i}'] = _ref_decoder_block(
                    blocks[f'x_{depth_idx}_{dense_l_i}'],
                    dense_x[f'x_{depth_idx}_{dense_l_i - 1}'], cat)
    return _ref_decoder_block(blocks[f'x_0_{depth}'], dense_x[f'x_0_{depth - 1}'])


# ----------------------------------------------------------------------------
if __name__ == "__main__":
    key = jax.random.PRNGKey(0)
    # n_blocks = 3; encoder_channels[0] is dropped by the decoder.
    encoder_channels = (3, 8, 16, 32)
    decoder_channels = (24, 12, 8)

    k_params, k_feat = jax.random.split(key)
    blocks, depth = init_decoder(k_params, encoder_channels, decoder_channels,
                                 expansion_ratio=1, squeeze_ratio=1)
    packed_blocks = {name: pack_decoder_block(bp) for name, bp in blocks.items()}

    # Encoder features (NCHW), shallow -> deep, as the PyTorch decoder receives them.
    fk = jax.random.split(k_feat, 4)
    features = (
        jax.random.normal(fk[0], (2, 3, 32, 32), jnp.float32),   # dropped by the decoder
        jax.random.normal(fk[1], (2, 8, 16, 16), jnp.float32),
        jax.random.normal(fk[2], (2, 16, 8, 8), jnp.float32),
        jax.random.normal(fk[3], (2, 32, 4, 4), jnp.float32),    # head (deepest)
    )

    _roll_sign()  # resolve (and assert) pltpu.roll orientation once, outside of tracing

    fwd = jax.jit(lambda blks, feats: decoder_forward(blks, depth, feats))
    out = jax.block_until_ready(fwd(packed_blocks, features))
    assert out.shape == (2, 8, 32, 32), out.shape
    assert bool(jnp.all(jnp.isfinite(out)))

    ref_fwd = jax.jit(lambda blks, feats: _ref_decoder_forward(blks, depth, feats))
    ref = jax.block_until_ready(ref_fwd(blocks, features))
    err = float(jnp.max(jnp.abs(out - ref)) / (jnp.max(jnp.abs(ref)) + 1e-6))
    # all-f32 path (typically ~1e-5); tightened from the previous 3e-2 gate
    assert err < 1e-2, f"kernel/reference mismatch: rel_err={err}"

    print("KERNEL_OK")
</pallas_src>

<mosaic_0001>
module attributes {stable_mosaic.version = 11 : i64} {
  func.func @_roll_probe_kernel(%arg0: memref<8x128xf32, #tpu.memory_space<vmem>>, %arg1: memref<8x128xf32, #tpu.memory_space<vmem>>) attributes {dimension_semantics = [], scalar_prefetch = 0 : i64, scratch_operands = 0 : i64, tpu.core_type = #tpu.core_type<tc>} {
    %c0 = arith.constant 0 : index
    %c0_0 = arith.constant 0 : index
    %0 = vector.load %arg0[%c0, %c0_0] : memref<8x128xf32, #tpu.memory_space<vmem>>, vector<8x128xf32>
    %c1_i32 = arith.constant 1 : i32
    %1 = tpu.dynamic_rotate %0 by %c1_i32 dim 1 : vector<8x128xf32>, i32 -> vector<8x128xf32>
    %c0_1 = arith.constant 0 : index
    %c0_2 = arith.constant 0 : index
    %2 = vector.load %arg1[%c0_1, %c0_2] : memref<8x128xf32, #tpu.memory_space<vmem>>, vector<8x128xf32>
    tpu.vector_store %arg1[%c0_1, %c0_2], %1 {strides = array<i32>} : memref<8x128xf32, #tpu.memory_space<vmem>>, vector<8x128xf32>,
    return
  }
}

</mosaic_0001>

<bundles_post_ra>
// kernel: tpu_custom_call.1
= control target key start
LH: loop header
LB: loop body
LE: loop exit
PB: predicated region body
PF: predicated region fallthrough
CT: control target
= control target key end

     0   :  { %6 = vsyncpa [#allocation3], 0  ;;  %s128_s0 = inlined_call_operand.hbm [shape: f32[8,128], index: 0, kind: input, shape index: {}]   ;;  %s129_s1 = inlined_call_operand.hbm [shape: f32[8,128], index: 1, kind: output, shape index: {}]  }
   0x1   :  { %7 = vsyncpa [#allocation4], 0  ;;  %s91_s6 = smov [#allocation2]   ;;  %s43_s10 = scalar_lea.hbm %s128_s0, 128 }
   0x2   :  { %s14_s7 = sshll.u32 %s91_s6, 4  ;;  %p44_p0 = scmp.ne.s32.totalorder %s128_s0, %s43_s10  ;;  %s15_s7 = int_to_ptr.vmem [resolvable:$true] %s14_s7 }
   0x3   :  { %p47_p1 = scmp.lt.u32.totalorder %s43_s10, %s128_s0 }
   0x5   :  { %p49_p2 = pnand %p47_p1, %p44_p0 }
   0x7   :  { %52 = shalt.err (!%p49_p2)
}
   0x8   :  { %s53_s15 = scalar_lea.vmem %s15_s7, 128  ;;  %p58_p4 = scmp.lt.s32.totalorder %s15_s7, %s15_s7 }
   0x9   :  { %p54_p3 = scmp.ne.s32.totalorder %s15_s7, %s53_s15  ;;  %p59_p5 = scmp.lt.s32.totalorder %s53_s15, %s53_s15 }
   0xb   :  { %p60_p6 = por %p59_p5, %p58_p4 }
   0xd   :  { %p61_p7 = pnand %p60_p6, %p54_p3 }
   0xf   :  { %64 = shalt.err (!%p61_p7)
}
  0x10   :  { %17 = dma.hbm_to_vmem [thread:$0]  %s128_s0, 128, %s15_s7, [#allocation3]  }
  0x11   :  { %87 = dma.done.wait [#allocation3], 128  }
  0x12   :  { %88 = vsyncadd [#allocation3], 4294967168  ;;  %v21_v0 = vld [vmem:[#allocation2] sm:$0xff]  ;;  %s92_s18 = smov 1   ;;  %s93_s19 = smov [#allocation5]  }
  0x13   :  { %22 = vrot.lane.b32.xlu0 %v21_v0, %s92_s18  ;;  %s31_s20 = sshll.u32 %s93_s19, 4  ;;  %s32_s20 = int_to_ptr.vmem [resolvable:$true] %s31_s20 }
  0x14   :  { %s65_s21 = scalar_lea.vmem %s32_s20, 128  ;;  %p70_p9 = scmp.lt.s32.totalorder %s32_s20, %s32_s20 }
  0x15   :  { %p66_p8 = scmp.ne.s32.totalorder %s32_s20, %s65_s21  ;;  %p71_p10 = scmp.lt.s32.totalorder %s65_s21, %s65_s21 }
  0x17   :  { %p72_p11 = por %p71_p10, %p70_p9 }
  0x19   :  { %p73_p12 = pnand %p72_p11, %p66_p8 }
  0x85   :  { %v23_v1 = vpop.permute.xlu0 %22 }
  0x86   :  { %24 = vst [vmem:[#allocation5] sm:$0xff] %v23_v1 }
  0x87   :  { %76 = shalt.err (!%p73_p12)
}
  0x88   :  { %s77_s0 = scalar_lea.hbm %s129_s1, 128 }
  0x89   :  { %p78_p13 = scmp.ne.s32.totalorder %s129_s1, %s77_s0  ;;  %p81_p0 = scmp.lt.u32.totalorder %s77_s0, %s129_s1 }
  0x8b   :  { %p83_p1 = pnand %p81_p0, %p78_p13 }
  0x8d   :  { %86 = shalt.err (!%p83_p1)
}
  0x8e   :  { %34 = dma.vmem_to_hbm [thread:$0]  %s32_s20, 128, %s129_s1, [#allocation4]  }
  0x8f   :  { %89 = dma.done.wait [#allocation4], 128  }
  0x90   :  { %90 = vsyncadd [#allocation4], 4294967168 }
  0x91   :  { %38 = vsyncpa [#allocation3], 1 }
  0x92   :  { %39 = vsyncpa [#allocation4], 1 }

</bundles_post_ra>
